<compile_context>
chip_gen: v6e
topology: v6e:2x2x1
jax: 0.10.0
libtpu: 0.0.40
codegen_flags: <defaults>
</compile_context>

<pallas_src>
import jax
import jax.numpy as jnp
from jax.experimental import pallas as pl
from jax.experimental.pallas import tpu as pltpu


_LANE = 128
_SUBLANE = 8
_VMEM_BUFFER_BUDGET = 32 * 1024 * 1024   # bytes our tiles may occupy (portable to v7x)
_VMEM_LIMIT_BYTES = 48 * 1024 * 1024     # scoped VMEM limit handed to Mosaic


def _round_up(x, m):
    return ((x + m - 1) // m) * m


def _linear_probe_kernel(x_ref, w_ref, b_ref, o_ref):
    # x_ref: (tm, D) bf16   w_ref: (D, Cp) bf16   b_ref: (1, Cp) f32   o_ref: (tm, Cp) f32
    acc = jnp.dot(x_ref[...], w_ref[...], preferred_element_type=jnp.float32)
    o_ref[...] = (acc + b_ref[...]).astype(o_ref.dtype)


def _pick_row_tile(M, D, C_pad, x_bytes, w_bytes, out_bytes):
    """Largest row tile whose VMEM footprint (double-buffered x / single-buffered
    weight+bias / double-buffered out) fits the budget.  Capped so the grid has
    >= 2 steps whenever there is enough work (keeps both v7x TensorCores busy)."""
    cap = max(_SUBLANE, _round_up(pl.cdiv(M, 2), _SUBLANE))
    for tm in (1024, 512, 256, 128, 64, 32, 16, 8):
        if tm > cap:
            continue
        vmem = (2 * tm * D * x_bytes            # x rows, double-buffered
                + 1 * D * C_pad * w_bytes       # weight, resident, single-buffered
                + 1 * C_pad * 4                 # bias, single-buffered
                + 2 * tm * C_pad * out_bytes)   # output, double-buffered
        if vmem <= _VMEM_BUFFER_BUDGET:
            return tm
    return _SUBLANE


def linear_prober_forward(patch_tokens, weight, bias, *, tm=None,
                          compute_dtype=jnp.bfloat16):
    """Apply the linear probing layer to patch tokens.

    patch_tokens: [B, T, D] float32
    weight:       [C, D]    float32  (PyTorch nn.Linear convention)
    bias:         [C]       float32
    returns:      [B, T, C] float32
    """
    B, T, D = patch_tokens.shape
    C = weight.shape[0]
    out_dtype = patch_tokens.dtype
    M = B * T

    # Lane-dense output: pad the class dim to a multiple of 128 (use 256 on
    # v6e/v7x for very large class counts if desired; 128 keeps stores unmasked).
    C_pad = _round_up(C, _LANE)

    x2d = patch_tokens.reshape(M, D).astype(compute_dtype)
    w_t = weight.T.astype(compute_dtype)                       # [D, C]
    if C_pad != C:
        w_t = jnp.pad(w_t, ((0, 0), (0, C_pad - C)))
        bias_p = jnp.pad(bias, (0, C_pad - C))
    else:
        bias_p = bias
    b2d = bias_p.reshape(1, C_pad).astype(jnp.float32)

    x_bytes = jnp.dtype(compute_dtype).itemsize
    out_bytes = jnp.dtype(out_dtype).itemsize
    if tm is None:
        tm = _pick_row_tile(M, D, C_pad, x_bytes, x_bytes, out_bytes)

    # Row padding so any B*T works with the chosen tile (padded rows are junk
    # bias-only outputs and are sliced off below).
    M_pad = _round_up(M, tm)
    if M_pad != M:
        x2d = jnp.pad(x2d, ((0, M_pad - M), (0, 0)))

    grid = (M_pad // tm,)

    cost = pl.CostEstimate(
        flops=2 * M_pad * D * C_pad,
        transcendentals=0,
        bytes_accessed=(M_pad * D * x_bytes + D * C_pad * x_bytes
                        + C_pad * 4 + M_pad * C_pad * out_bytes),
    )

    out2d = pl.pallas_call(
        _linear_probe_kernel,
        out_shape=jax.ShapeDtypeStruct((M_pad, C_pad), out_dtype),
        grid_spec=pltpu.PrefetchScalarGridSpec(
            num_scalar_prefetch=0,
            grid=grid,
            in_specs=[
                # Activations: streamed row tiles, default double-buffering.
                pl.BlockSpec((tm, D), lambda i: (i, 0)),
                # Weight: constant index_map -> resident, single-buffered.
                pl.BlockSpec((D, C_pad), lambda i: (0, 0),
                             pipeline_mode=pl.Buffered(1)),
                # Bias: constant, single-buffered.
                pl.BlockSpec((1, C_pad), lambda i: (0, 0),
                             pipeline_mode=pl.Buffered(1)),
            ],
            out_specs=pl.BlockSpec((tm, C_pad), lambda i: (i, 0)),
        ),
        compiler_params=pltpu.CompilerParams(
            dimension_semantics=("parallel",),
            vmem_limit_bytes=_VMEM_LIMIT_BYTES,
        ),
        cost_estimate=cost,
    )(x2d, w_t, b2d)

    return out2d[:M, :C].reshape(B, T, C)


if __name__ == "__main__":
    # Small synthetic shapes consistent with the module's forward:
    #   B=2 images, T=64 patch tokens, embed_dim D=128, n_classes C=16.
    B, T, D, C = 2, 64, 128, 16

    key = jax.random.PRNGKey(0)
    k_x, k_w, k_b = jax.random.split(key, 3)

    # Stand-in for visual_backbone(...)['x_norm_patchtokens'].
    patch_tokens = jax.random.normal(k_x, (B, T, D), dtype=jnp.float32)

    # Deterministic nn.Linear-style init: U(-1/sqrt(D), 1/sqrt(D)).
    bound = 1.0 / jnp.sqrt(jnp.float32(D))
    weight = jax.random.uniform(k_w, (C, D), minval=-bound, maxval=bound,
                                dtype=jnp.float32)
    bias = jax.random.uniform(k_b, (C,), minval=-bound, maxval=bound,
                              dtype=jnp.float32)

    out = linear_prober_forward(patch_tokens, weight, bias)
    out = jax.block_until_ready(out)
    assert out.shape == (B, T, C)

    # Tight check against a bf16-input / f32-accumulate reference (matches the
    # kernel's MXU path).
    ref_bf16 = (patch_tokens.astype(jnp.bfloat16).astype(jnp.float32)
                @ weight.astype(jnp.bfloat16).astype(jnp.float32).T) + bias
    assert jnp.allclose(out, ref_bf16, atol=1e-3, rtol=1e-3)

    # Loose check against the pure-f32 PyTorch-equivalent reference (bf16 input
    # cast is the only source of error).
    ref_f32 = patch_tokens @ weight.T + bias
    assert jnp.allclose(out, ref_f32, atol=2e-2, rtol=2e-2)

    print("KERNEL_OK")
</pallas_src>

<mosaic_0001>
module attributes {stable_mosaic.version = 11 : i64} {
  func.func @_linear_probe_kernel(%arg0: i32, %arg1: memref<64x128xbf16, #tpu.memory_space<vmem>>, %arg2: memref<128x128xbf16, #tpu.memory_space<vmem>>, %arg3: memref<1x128xf32, #tpu.memory_space<vmem>>, %arg4: memref<64x128xf32, #tpu.memory_space<vmem>>) attributes {dimension_semantics = [#tpu.dimension_semantics<parallel>], iteration_bounds = array<i64: 2>, scalar_prefetch = 0 : i64, scratch_operands = 0 : i64, tpu.core_type = #tpu.core_type<tc>, window_params = [{transform_indices = @transform_0, window_bounds = array<i64: 64, 128>}, {pipeline_mode = #tpu.pipeline_mode<synchronous>, transform_indices = @transform_1, window_bounds = array<i64: 128, 128>}, {pipeline_mode = #tpu.pipeline_mode<synchronous>, transform_indices = @transform_2, window_bounds = array<i64: 1, 128>}, {transform_indices = @transform_3, window_bounds = array<i64: 64, 128>}]} {
    %c0 = arith.constant 0 : index
    %c0_0 = arith.constant 0 : index
    %0 = vector.load %arg1[%c0, %c0_0] : memref<64x128xbf16, #tpu.memory_space<vmem>>, vector<64x128xbf16>
    %c0_1 = arith.constant 0 : index
    %c0_2 = arith.constant 0 : index
    %1 = vector.load %arg2[%c0_1, %c0_2] : memref<128x128xbf16, #tpu.memory_space<vmem>>, vector<128x128xbf16>
    %cst = arith.constant dense<0.000000e+00> : vector<64x128xf32>
    %2 = tpu.matmul %0, %1, %cst {dimension_numbers = #tpu.dot_dimension_numbers<[1], [0], [0], [1], [0, 0, 1, 1], [], []>} : vector<64x128xbf16>, vector<128x128xbf16>, vector<64x128xf32> -> vector<64x128xf32>
    %c0_3 = arith.constant 0 : index
    %c0_4 = arith.constant 0 : index
    %3 = vector.load %arg3[%c0_3, %c0_4] : memref<1x128xf32, #tpu.memory_space<vmem>>, vector<1x128xf32>
    %4 = vector.broadcast %3 : vector<1x128xf32> to vector<64x128xf32>
    %5 = arith.addf %2, %4 : vector<64x128xf32>
    %c0_5 = arith.constant 0 : index
    %c0_6 = arith.constant 0 : index
    %6 = vector.load %arg4[%c0_5, %c0_6] : memref<64x128xf32, #tpu.memory_space<vmem>>, vector<64x128xf32>
    tpu.vector_store %arg4[%c0_5, %c0_6], %5 {strides = array<i32>} : memref<64x128xf32, #tpu.memory_space<vmem>>, vector<64x128xf32>,
    return
  }
  func.func @transform_0(%arg0: i32) -> (i32, i32) {
    %c0_i32 = arith.constant 0 : i32
    %c0_i32_0 = arith.constant 0 : i32
    return %arg0, %c0_i32 : i32, i32
  }
  func.func @transform_1(%arg0: i32) -> (i32, i32) {
    %c0_i32 = arith.constant 0 : i32
    %c0_i32_0 = arith.constant 0 : i32
    %c0_i32_1 = arith.constant 0 : i32
    return %c0_i32, %c0_i32_0 : i32, i32
  }
  func.func @transform_2(%arg0: i32) -> (i32, i32) {
    %c0_i32 = arith.constant 0 : i32
    %c0_i32_0 = arith.constant 0 : i32
    %c0_i32_1 = arith.constant 0 : i32
    return %c0_i32, %c0_i32_0 : i32, i32
  }
  func.func @transform_3(%arg0: i32) -> (i32, i32) {
    %c0_i32 = arith.constant 0 : i32
    %c0_i32_0 = arith.constant 0 : i32
    return %arg0, %c0_i32 : i32, i32
  }
}

</mosaic_0001>

<bundles_post_ra>
// kernel: tpu_custom_call.1
= control target key start
LH: loop header
LB: loop body
LE: loop exit
PB: predicated region body
PF: predicated region fallthrough
CT: control target
= control target key end

     0   :  { %8 = vsyncpa [#allocation3], 0  ;;  %s980_s0 = inlined_call_operand.hbm [shape: bf16[128,128], index: 0, kind: input, shape index: {}]   ;;  %s981_s1 = inlined_call_operand.hbm [shape: bf16[128,128], index: 1, kind: input, shape index: {}]   ;;  %s982_s2 = inlined_call_operand.vmem [shape: f32[1,128], index: 2, kind: input, shape index: {}]   ;;  %s983_s3 = inlined_call_operand.hbm [shape: f32[128,128], index: 3, kind: output, shape index: {}]  }
   0x1   :  { %10 = vsyncpa [#allocation3 + $0x1], 0 }
   0x2   :  { %11 = vsyncpa [#allocation6], 0 }
   0x3   :  { %12 = vsyncpa [#allocation4], 0 }
   0x4   :  { %14 = vsyncpa [#allocation4 + $0x1], 0  ;;  %s787_s12 = smov 0   ;;  %s789_s13 = smov 0  }
   0x5   :  { %s791_s14 = smov 0   ;;  %s793_s15 = smov 0  }
   0x6 LB: > { %s808_s16 = sadd.s32 4294967295, %s758_s15   ;;  %s480_s17 = sadd.s32 4294967294, %s758_s15   ;;  %s758_s15 = sphi %s793_s15, %s1005_s15   ;;  %s754_s14 = sphi %s791_s14, %s1004_s14   ;;  %s750_s13 = sphi %s789_s13, %s1003_s13   ;;  %s746_s12 = sphi %s787_s12, %s1002_s12  }
   0x7   : > { %p40_p0 = scmp.ne.s32.totalorder %s750_s13, %s746_s12  ;;  %p984_p1 = scmp.eq.s32.totalorder %s808_s16, 0 }
   0x8   : > { %p112_p3 = scmp.eq.s32.totalorder %s480_s17, 1  ;;  %p481_p5 = scmp.ge.s32.totalorder %s758_s15, 1 }
   0x9   : > { %p817_p4 = por %p984_p1, %p40_p0  ;;  %p119_p7 = scmp.lt.s32.totalorder %s758_s15, 3 }
   0xa   : > { %p822_p6 = por %p112_p3, %p40_p0  ;;  %s760_s21 = smov [#allocation5]  }
   0xb   : > { %s988_s18 = scalar_select %p817_p4, 1, 0 }
   0xc   : > { %s989_s19 = scalar_select %p822_p6, 1, 0 }
   0xd   : > { %p827_p8 = pnand %p481_p5, %p119_p7  ;;  %s131_s22 = sshll.u32 %s760_s21, 4  ;;  %s132_s22 = int_to_ptr.vmem [resolvable:$true] %s131_s22 }
   0xe   : > { %s841_s24 = sadd.s32 1, %s758_s15   ;;  %s27_s25 = sadd.s32 1, %s754_s14 }
   0xf   : > { %s990_s20 = scalar_select %p827_p8, 1, 0 }
  0x10   : > { %p571_p9 = pneg %p827_p8  ;;  %s24_s26 = ssub.s32 %s758_s15, %s841_s24 }
  0x11   : > { %s647_s27 = scalar_lea.vmem %s132_s22, 1024  ;;  %p655_p5 = scmp.lt.s32.totalorder %s132_s22, %s132_s22 }
  0x12   : > { %p836_p11 = pnand %p571_p9, %p984_p1  ;;  %p648_p13 = scmp.ne.s32.totalorder %s132_s22, %s647_s27 }
  0x13   : > { %p656_p7 = scmp.lt.s32.totalorder %s647_s27, %s647_s27 }
  0x14   : > { %p638_p12 = pneg %p836_p11 }
  0x15   : > { %p657_p10 = por %p656_p7, %p655_p5 }
  0x16   : > { %p650_p0 = pnand %p648_p13, %p638_p12 }
  0x18   : > { %p651_p3 = pneg %p650_p0 }
  0x1a   : > { %p658_p2 = pnand %p657_p10, %p651_p3 }
  0x1c   : > { %661 = shalt.err (!%p658_p2)
}
  0x1d   : > { %s761_s28 = smov 64   ;;  %s762_s29 = smov 4  }
  0x1e   : > { %574 = dma.hbm_to_vmem [thread:$0]  (!%p836_p11), %s981_s1, 1024, %s132_s22, [#allocation6], %s761_s28, %s761_s28, %s762_s29  }
  0x1f   : > { %p25_p2 = scmp.eq.s32.totalorder %s24_s26, 0  ;;  %p34_p9 = scmp.ne.s32.totalorder %s754_s14, %s750_s13 }
  0x20   : > { %p35_p10 = scmp.eq.s32.totalorder %s758_s15, 0  ;;  %p584_p12 = scmp.lt.s32.totalorder %s758_s15, 2 }
  0x21   : > { %s861_s5 = scalar_select %p25_p2, %s754_s14, %s27_s25  }
  0x22   : > { %p36_p13 = por %p35_p10, %p34_p9  ;;  %p992_p0 = scmp.eq.s32.totalorder %s808_s16, 1 }
  0x23   : > { %s148_s7 = sand.u32 1, %s754_s14   ;;  %s509_s8 = sshll.u32 %s758_s15, 9 }
  0x24   : > { %p865_p3 = por %p992_p0, %p34_p9  ;;  %s484_s9 = sshll.u32 %s148_s7, 5 }
  0x25   : > { %s874_s17 = scalar_lea.hbm %s980_s0, %s509_s8  ;;  %s152_s21 = scalar_lea.vmem [#allocation2], %s484_s9 }
  0x26   : > { %s993_s6 = scalar_select %p865_p3, 1, 0 }
  0x27   : > { %s159_s22 = sshll.u32 %s152_s21, 4  ;;  %p876_p11 = pnand %p584_p12, %p36_p13  ;;  %s880_s22 = int_to_ptr.vmem [resolvable:$true] %s159_s22 }
  0x28   : > { %s882_s25 = scalar_lea.sflag [#allocation3], %s148_s7  ;;  %s662_s26 = scalar_lea.hbm %s874_s17, 512 }
  0x29   : > { %p663_p5 = scmp.ne.s32.totalorder %s874_s17, %s662_s26  ;;  %p664_p7 = pneg %p876_p11 }
  0x2a   : > { %s667_s4 = scalar_lea.hbm %s980_s0, 1024  ;;  %p668_p10 = scmp.lt.s32.totalorder %s874_s17, %s980_s0 }
  0x2b   : > { %p665_p2 = pnand %p664_p7, %p663_p5  ;;  %p669_p12 = scmp.lt.s32.totalorder %s667_s4, %s662_s26 }
  0x2d   : > { %p666_p9 = pneg %p665_p2  ;;  %p670_p13 = por %p669_p12, %p668_p10 }
  0x2f   : > { %p671_p0 = pnand %p670_p13, %p666_p9 }
  0x31   : > { %674 = shalt.err (!%p671_p0)
}
  0x32   : > { %s675_s7 = scalar_lea.vmem %s880_s22, 512  ;;  %s763_s10 = smov [#allocation2]  }
  0x33   : > { %p676_p1 = scmp.ne.s32.totalorder %s880_s22, %s675_s7  ;;  %s680_s11 = sshll.u32 %s763_s10, 4  ;;  %s681_s11 = int_to_ptr.vmem [resolvable:$false] %s680_s11 }
  0x34   : > { %s682_s21 = scalar_lea.vmem %s681_s11, 1024  ;;  %p683_p2 = scmp.lt.s32.totalorder %s880_s22, %s681_s11 }
  0x35   : > { %p678_p6 = pnand %p676_p1, %p664_p7  ;;  %p684_p3 = scmp.lt.s32.totalorder %s682_s21, %s675_s7 }
  0x37   : > { %p679_p5 = pneg %p678_p6  ;;  %p685_p4 = por %p684_p3, %p683_p2 }
  0x39   : > { %p686_p8 = pnand %p685_p4, %p679_p5 }
  0x3b   : > { %689 = shalt.err (!%p686_p8)
}
  0x3c   : > { %578 = dma.hbm_to_vmem [thread:$0]  (!%p876_p11), %s874_s17, 512, %s880_s22, %s882_s25, %s761_s28, %s761_s28, %s762_s29  }
  0x3d   : > { %p995_p1 = scmp.ne.s32.totalorder %s990_s20, 0 }
  0x3e   : > { %s909_s26 = sand.u32 (!%p995_p1), 1, %s750_s13   ;;  %p996_p4 = scmp.ne.s32.totalorder (!%p995_p1), %s988_s18, 0 }
  0x3f   : > { %171 = sbr.rel (%p995_p1) target bundleno = 320 (0x140), region = 32  ;;  %s488_s27 = sshll.u32 (!%p995_p1), %s909_s26, 5 }
  0x40   : > { %s174_s30 = scalar_lea.sflag (!%p995_p1), [#allocation3], %s909_s26  ;;  %s913_s4 = scalar_lea.vmem (!%p995_p1), [#allocation2], %s488_s27 }
  0x44   : > { %733 = dma.done.wait (%p996_p4), %s174_s30, 512  }
  0x45   : > { %735 = vsyncadd (%p996_p4), %s174_s30, 4294966784  ;;  %p997_p6 = scmp.eq.s32.totalorder %s808_s16, 0 }
  0x47   : > { %737 = dma.done.wait (%p997_p6), [#allocation6], 1024   ;;  %p998_p8 = pmov %p997_p6 }
  0x48   : > { %v624_v0 = vld [vmem:[#allocation5 + $0x38] sm:$0xff]   ;;  %v625_v1 = vld [vmem:[#allocation5 + $0x30] sm:$0xff]   ;;  %v626_v2 = vld [vmem:[#allocation5 + $0x28] sm:$0xff]   ;;  %s490_s18 = sshll.u32 %s909_s26, 6  ;;  %s510_s22 = sshll.u32 %s808_s16, 10 }
  0x49   : > { %739 = vsyncadd (%p998_p8), [#allocation6], 4294966272  ;;  %523 = vmatprep.subr.bf16.mxu0 %v624_v0  ;;  %547 = vmatprep.subr.bf16.mxu1 %v624_v0  ;;  %v627_v3 = vld [vmem:[#allocation5 + $0x20] sm:$0xff]   ;;  %v633_v5 = vld [vmem:[%s913_s4 + $0x10] sm:$0xff]   ;;  %s203_s29 = scalar_lea.vmem [#allocation7], %s490_s18  ;;  %s937_s8 = scalar_lea.hbm %s983_s3, %s510_s22 }
  0x4a   : > { %524 = vmatpush3.bf16.msra.mxu0 %v624_v0  ;;  %555 = vmatpush3.bf16.msra.mxu1 %v624_v0  ;;  %v632_v4 = vld [vmem:[%s913_s4] sm:$0xff]   ;;  %v628_v6 = vld [vmem:[#allocation5 + $0x18] sm:$0xff]   ;;  %v629_v7 = vld [vmem:[#allocation5 + $0x10] sm:$0xff]   ;;  %s397_s17 = sshll.u32 %s203_s29, 4  ;;  %s384_s16 = scalar_lea.sflag [#allocation4], %s909_s26  ;;  %s932_s17 = int_to_ptr.vmem [resolvable:$true] %s397_s17 }
  0x4b   : > { %525 = vmatprep.subr.bf16.mxu0 %v625_v1  ;;  %548 = vmatprep.subr.bf16.mxu1 %v625_v1  ;;  %v630_v8 = vld [vmem:[#allocation5 + $0x8] sm:$0xff]   ;;  %v631_v9 = vld [vmem:[#allocation5] sm:$0xff]   ;;  %v635_v11 = vld [vmem:[%s913_s4 + $0x18] sm:$0xff]   ;;  %s690_s9 = scalar_lea.vmem %s932_s17, 1024  ;;  %p999_p11 = scmp.ne.s32.totalorder %s993_s6, 0 }
  0x4c   : > { %539 = vmatprep.mubr.bf16.mxu0 %v632_v4  ;;  %543 = vmatprep.mubr.bf16.mxu1 %v633_v5  ;;  %v634_v10 = vld [vmem:[%s913_s4 + $0x8] sm:$0xff]   ;;  %v491_v12 = vld [vmem:[%s982_s2] ss:$0 sm:$0xff]  ;;  %p691_p3 = scmp.ne.s32.totalorder %s932_s17, %s690_s9  ;;  %s764_s7 = smov [#allocation7]  }
  0x4d   : > { %s694_s10 = sshll.u32 %s764_s7, 4  ;;  %s695_s10 = int_to_ptr.vmem [resolvable:$false] %s694_s10 }
  0x4e   : > { %526 = vmatpush3.bf16.msra.mxu0 %v625_v1  ;;  %556 = vmatpush3.bf16.msra.mxu1 %v625_v1  ;;  %p692_p7 = pnand %p691_p3, %p999_p11  ;;  %s696_s11 = scalar_lea.vmem %s695_s10, 2048 }
  0x4f   : > { %527 = vmatprep.subr.bf16.mxu0 %v626_v2  ;;  %549 = vmatprep.subr.bf16.mxu1 %v626_v2  ;;  %p697_p10 = scmp.lt.s32.totalorder %s932_s17, %s695_s10  ;;  %p698_p12 = scmp.lt.s32.totalorder %s696_s11, %s690_s9 }
  0x50   : > { %p693_p9 = pneg %p692_p7 }
  0x51   : > { %p699_p13 = por %p698_p12, %p697_p10 }
  0x52   : > { %528 = vmatpush3.bf16.msra.mxu0 %v626_v2  ;;  %557 = vmatpush3.bf16.msra.mxu1 %v626_v2 }
  0x53   : > { %529 = vmatprep.subr.bf16.mxu0 %v627_v3  ;;  %550 = vmatprep.subr.bf16.mxu1 %v627_v3  ;;  %p700_p0 = pnand %p699_p13, %p693_p9 }
  0x56   : > { %530 = vmatpush3.bf16.msra.mxu0 %v627_v3  ;;  %558 = vmatpush3.bf16.msra.mxu1 %v627_v3 }
  0x57   : > { %531 = vmatprep.subr.bf16.mxu0 %v628_v6  ;;  %551 = vmatprep.subr.bf16.mxu1 %v628_v6 }
  0x5a   : > { %532 = vmatpush3.bf16.msra.mxu0 %v628_v6  ;;  %559 = vmatpush3.bf16.msra.mxu1 %v628_v6 }
  0x5b   : > { %533 = vmatprep.subr.bf16.mxu0 %v629_v7  ;;  %552 = vmatprep.subr.bf16.mxu1 %v629_v7 }
  0x5e   : > { %534 = vmatpush3.bf16.msra.mxu0 %v629_v7  ;;  %560 = vmatpush3.bf16.msra.mxu1 %v629_v7 }
  0x5f   : > { %535 = vmatprep.subr.bf16.mxu0 %v630_v8  ;;  %553 = vmatprep.subr.bf16.mxu1 %v630_v8 }
  0x62   : > { %536 = vmatpush3.bf16.msra.mxu0 %v630_v8  ;;  %561 = vmatpush3.bf16.msra.mxu1 %v630_v8 }
  0x63   : > { %537 = vmatprep.subr.bf16.mxu0 %v631_v9  ;;  %554 = vmatprep.subr.bf16.mxu1 %v631_v9 }
  0x66   : > { %538 = vmatpush3.bf16.msra.mxu0 %v631_v9  ;;  %562 = vmatpush3.bf16.msra.mxu1 %v631_v9 }
  0x69   : > { %540 = vmatmul.mubr.bf16.vlgmr.msra.gmra.mxu0 %v634_v10  ;;  %544 = vmatmul.mubr.bf16.vlgmr.msra.gmra.mxu1 %v635_v11 }
 0x129   : > { %v541_v13 = vpop.f32.mrf.mxu0  ;;  %v545_v14 = vpop.f32.mrf.mxu1 }
 0x12a   : > { %v353_v15 = vadd.f32 %v541_v13, %v491_v12  ;;  %v369_v16 = vadd.f32 %v545_v14, %v491_v12 }
 0x12b   : > { %v344_v17 = vpop.f32.mrf.mxu0  ;;  %v360_v18 = vpop.f32.mrf.mxu1 }
 0x12c   : > { %377 = vst [vmem:[%s203_s29 + $0x10] sm:$0xff] %v353_v15  ;;  %381 = vst [vmem:[%s203_s29 + $0x30] sm:$0xff] %v369_v16  ;;  %v345_v19 = vadd.f32 %v491_v12, %v344_v17  ;;  %v361_v20 = vadd.f32 %v491_v12, %v360_v18 }
 0x12d   : > { %v542_v21 = vpop.f32.mrf.mxu0  ;;  %v546_v22 = vpop.f32.mrf.mxu1 }
 0x12e   : > { %375 = vst [vmem:[%s203_s29] sm:$0xff] %v345_v19  ;;  %379 = vst [vmem:[%s203_s29 + $0x20] sm:$0xff] %v361_v20  ;;  %v356_v23 = vadd.f32 %v542_v21, %v491_v12  ;;  %v372_v24 = vadd.f32 %v546_v22, %v491_v12 }
 0x12f   : > { %v347_v25 = vpop.f32.mrf.mxu0  ;;  %v363_v26 = vpop.f32.mrf.mxu1 }
 0x130   : > { %378 = vst [vmem:[%s203_s29 + $0x18] sm:$0xff] %v356_v23  ;;  %382 = vst [vmem:[%s203_s29 + $0x38] sm:$0xff] %v372_v24  ;;  %v348_v27 = vadd.f32 %v491_v12, %v347_v25  ;;  %v364_v28 = vadd.f32 %v491_v12, %v363_v26 }
 0x132   : > { %376 = vst [vmem:[%s203_s29 + $0x8] sm:$0xff] %v348_v27  ;;  %380 = vst [vmem:[%s203_s29 + $0x28] sm:$0xff] %v364_v28 }
 0x133   : > { %703 = shalt.err (!%p700_p0)
}
 0x134   : > { %s704_s21 = scalar_lea.hbm %s937_s8, 1024  ;;  %s708_s4 = scalar_lea.hbm %s983_s3, 2048 }
 0x135   : > { %p705_p5 = scmp.ne.s32.totalorder %s937_s8, %s704_s21  ;;  %p709_p4 = scmp.lt.s32.totalorder %s937_s8, %s983_s3 }
 0x136   : > { %p710_p6 = scmp.lt.s32.totalorder %s708_s4, %s704_s21 }
 0x137   : > { %p706_p2 = pnand %p705_p5, %p999_p11 }
 0x138   : > { %p711_p8 = por %p710_p6, %p709_p4 }
 0x139   : > { %p707_p1 = pneg %p706_p2 }
 0x13b   : > { %p712_p3 = pnand %p711_p8, %p707_p1 }
 0x13d   : > { %715 = shalt.err (!%p712_p3)
}
 0x13e   : > { %s765_s28 = smov 128   ;;  %s766_s29 = smov 8  }
 0x13f   : > { %569 = dma.vmem_to_hbm [thread:$0]  (%p999_p11), %s932_s17, 1024, %s937_s8, %s384_s16, %s765_s28, %s765_s28, %s766_s29  }
 0x140 PF: > { %s412_s22 = sand.u32 1, %s746_s12   ;;  %p1000_p7 = scmp.ne.s32.totalorder %s989_s19, 0 }
 0x141   : > { %p1001_p9 = scmp.ge.s32.totalorder %s758_s15, 2  ;;  %s413_s23 = scalar_lea.sflag [#allocation4], %s412_s22 }
 0x143   : > { %p580_p10 = pnand %p1001_p9, %p1000_p7 }
 0x145   : > { %p581_p12 = pneg %p580_p10 }
 0x147   : > { %741 = dma.done.wait (%p581_p12), %s413_s23, 1024  }
 0x148   : > { %743 = vsyncadd (%p581_p12), %s413_s23, 4294966272  ;;  %p17_p13 = scmp.ge.s32.totalorder %s841_s24, 4   ;;  %s1002_s12 = smov %s750_s13 }
 0x149   : > { %s1003_s13 = smov %s754_s14  ;;  %s1004_s14 = smov %s861_s5 }
 0x14a   : > { %s1005_s15 = smov %s841_s24  ;;  %19 = sbr.rel (!%p17_p13) target bundleno = 6 (0x6), region = 81 }
 0x14f   :  { %418 = vsyncpa [#allocation3], 1 }
 0x150   :  { %420 = vsyncpa [#allocation3 + $0x1], 1 }
 0x151   :  { %421 = vsyncpa [#allocation6], 1 }
 0x152   :  { %422 = vsyncpa [#allocation4], 1 }
 0x153   :  { %424 = vsyncpa [#allocation4 + $0x1], 1 }

</bundles_post_ra>
